<compile_context>
chip_gen: v6e
topology: v6e:2x2x1
jax: 0.10.0
libtpu: 0.0.40
codegen_flags: <defaults>
</compile_context>

<pallas_src>
import functools

import jax
import jax.numpy as jnp
from jax.experimental import pallas as pl
from jax.experimental.pallas import tpu as pltpu


def _latent_layer_kernel(zcat_ref, wcat_ref, o_ref):
    # One MXU contraction over K = 2*D (both linear layers at once),
    # f32 accumulation, f32 tanh on the EUP, single store of the output tile.
    h = jnp.dot(zcat_ref[...], wcat_ref[...], preferred_element_type=jnp.float32)
    o_ref[...] = jnp.tanh(h).astype(o_ref.dtype)


def fuse_latent_layer_weights(w_hh, w_ih, compute_dtype=jnp.float32):
    """One-time parameter fusion (do at load time, NOT per forward call).

    nn.Linear stores W as (out, in) and applies x @ W.T.  Stacking the two
    transposed weights along the contraction axis gives
        W_cat = [[W_hh^T],
                 [W_ih^T]]   with shape (2*D, D)
    so that  concat([z1, z2], -1) @ W_cat == z1 @ W_hh^T + z2 @ W_ih^T.
    """
    return jnp.concatenate([w_hh.T, w_ih.T], axis=0).astype(compute_dtype)


@functools.partial(jax.jit, static_argnames=("block_b",))
def latent_layer_forward(z_lt_lm1, z_lm1, w_cat, *, block_b=512):
    """z_lt_lm1, z_lm1: (B, D);  w_cat: (2D, D) from fuse_latent_layer_weights."""
    B, D = z_lt_lm1.shape
    two_d, d_out = w_cat.shape
    assert two_d == 2 * D and d_out == D, "w_cat must be (2*D, D)"

    compute_dtype = w_cat.dtype  # f32 (exact) or bf16 (fast MXU path)

    # Fused concat(+cast) in the wrapper: the kernel sees one lane-contiguous
    # (B, 2D) activation slab; the cast fuses into the concat (no extra pass).
    z_cat = jnp.concatenate([z_lt_lm1, z_lm1], axis=-1).astype(compute_dtype)

    bb = min(block_b, B)
    grid_b = pl.cdiv(B, bb)

    return pl.pallas_call(
        _latent_layer_kernel,
        out_shape=jax.ShapeDtypeStruct((B, D), z_lt_lm1.dtype),
        grid_spec=pltpu.PrefetchScalarGridSpec(
            num_scalar_prefetch=0,
            grid=(grid_b,),
            in_specs=[
                # Activations: tiled over batch rows.
                pl.BlockSpec((bb, 2 * D), lambda i: (i, 0)),
                # Fused weights: same block for every grid step -> fetched once
                # and kept resident in VMEM.  (If D grows to real model sizes
                # on v7x's 64 MiB VMEM, tile K here and drop to a single
                # buffer via pipeline_mode=pl.Buffered(1).)
                pl.BlockSpec((2 * D, D), lambda i: (0, 0)),
            ],
            out_specs=pl.BlockSpec((bb, D), lambda i: (i, 0)),
        ),
        compiler_params=pltpu.CompilerParams(
            # Batch-row axis is embarrassingly parallel: lets Mosaic shard the
            # grid across both TensorCores on v7x (no-op on v5e/v6e).
            dimension_semantics=("parallel",),
        ),
    )(z_cat, w_cat)


if __name__ == "__main__":
    key = jax.random.PRNGKey(0)
    B, D = 8, 32  # batch, latent input_dim

    k1, k2, k3, k4 = jax.random.split(key, 4)
    z_lt_lm1 = jax.random.normal(k1, (B, D), dtype=jnp.float32)
    z_lm1 = jax.random.normal(k2, (B, D), dtype=jnp.float32)
    # nn.Linear-layout weights: (out_features, in_features).
    w_hh = jax.random.normal(k3, (D, D), dtype=jnp.float32) * 0.1
    w_ih = jax.random.normal(k4, (D, D), dtype=jnp.float32) * 0.1

    # Pure-JAX reference mirroring the PyTorch forward.
    ref = jnp.tanh(z_lt_lm1 @ w_hh.T + z_lm1 @ w_ih.T)

    # --- f32 MXU path: matches fp32 PyTorch semantics tightly. ---
    w_cat_f32 = fuse_latent_layer_weights(w_hh, w_ih, jnp.float32)  # once, at load
    out_f32 = latent_layer_forward(z_lt_lm1, z_lm1, w_cat_f32)
    out_f32 = jax.block_until_ready(out_f32)
    assert out_f32.shape == (B, D)
    assert jnp.allclose(out_f32, ref, atol=1e-5, rtol=1e-5)

    # --- bf16-MXU path (recommended perf config): bf16 operands, f32 accumulate,
    # f32 tanh.  Looser tolerance only reflects bf16 operand rounding. ---
    w_cat_bf16 = fuse_latent_layer_weights(w_hh, w_ih, jnp.bfloat16)  # once, at load
    out_bf16 = latent_layer_forward(z_lt_lm1, z_lm1, w_cat_bf16)
    out_bf16 = jax.block_until_ready(out_bf16)
    assert out_bf16.shape == (B, D)
    assert jnp.allclose(out_bf16, ref, atol=3e-2, rtol=3e-2)

    print("KERNEL_OK")
</pallas_src>

<mosaic_0001>
module attributes {stable_mosaic.version = 11 : i64} {
  func.func @_latent_layer_kernel(%arg0: i32, %arg1: memref<8x64xf32, #tpu.memory_space<vmem>>, %arg2: memref<64x32xf32, #tpu.memory_space<vmem>>, %arg3: memref<8x32xf32, #tpu.memory_space<vmem>>) attributes {dimension_semantics = [#tpu.dimension_semantics<parallel>], iteration_bounds = array<i64: 1>, scalar_prefetch = 0 : i64, scratch_operands = 0 : i64, tpu.core_type = #tpu.core_type<tc>, window_params = [{transform_indices = @transform_0, window_bounds = array<i64: 8, 64>}, {pipeline_mode = #tpu.pipeline_mode<synchronous>, transform_indices = @transform_1, window_bounds = array<i64: 64, 32>}, {transform_indices = @transform_2, window_bounds = array<i64: 8, 32>}]} {
    %c0 = arith.constant 0 : index
    %c0_0 = arith.constant 0 : index
    %0 = vector.load %arg1[%c0, %c0_0] : memref<8x64xf32, #tpu.memory_space<vmem>>, vector<8x64xf32>
    %c0_1 = arith.constant 0 : index
    %c0_2 = arith.constant 0 : index
    %1 = vector.load %arg2[%c0_1, %c0_2] : memref<64x32xf32, #tpu.memory_space<vmem>>, vector<64x32xf32>
    %cst = arith.constant dense<0.000000e+00> : vector<8x32xf32>
    %2 = tpu.matmul %0, %1, %cst {dimension_numbers = #tpu.dot_dimension_numbers<[1], [0], [0], [1], [0, 0, 1, 1], [], []>} : vector<8x64xf32>, vector<64x32xf32>, vector<8x32xf32> -> vector<8x32xf32>
    %3 = math.tanh %2 : vector<8x32xf32>
    %c0_3 = arith.constant 0 : index
    %c0_4 = arith.constant 0 : index
    %4 = vector.load %arg3[%c0_3, %c0_4] : memref<8x32xf32, #tpu.memory_space<vmem>>, vector<8x32xf32>
    tpu.vector_store %arg3[%c0_3, %c0_4], %3 {strides = array<i32>} : memref<8x32xf32, #tpu.memory_space<vmem>>, vector<8x32xf32>,
    return
  }
  func.func @transform_0(%arg0: i32) -> (i32, i32) {
    %c0_i32 = arith.constant 0 : i32
    %c0_i32_0 = arith.constant 0 : i32
    return %arg0, %c0_i32 : i32, i32
  }
  func.func @transform_1(%arg0: i32) -> (i32, i32) {
    %c0_i32 = arith.constant 0 : i32
    %c0_i32_0 = arith.constant 0 : i32
    %c0_i32_1 = arith.constant 0 : i32
    return %c0_i32, %c0_i32_0 : i32, i32
  }
  func.func @transform_2(%arg0: i32) -> (i32, i32) {
    %c0_i32 = arith.constant 0 : i32
    %c0_i32_0 = arith.constant 0 : i32
    return %arg0, %c0_i32 : i32, i32
  }
}

</mosaic_0001>

<bundles_post_ra>
// kernel: latent_layer_forward.1
= control target key start
LH: loop header
LB: loop body
LE: loop exit
PB: predicated region body
PF: predicated region fallthrough
CT: control target
= control target key end

     0   :  { %v168_v1 = vmov 0.0   ;;  %vm169_vm0 = vmmov 0   ;;  %s216_s0 = inlined_call_operand.vmem [shape: f32[8,64], index: 0, kind: input, shape index: {}]   ;;  %s217_s1 = inlined_call_operand.vmem [shape: f32[64,32], index: 1, kind: input, shape index: {}]   ;;  %s218_s2 = inlined_call_operand.hbm [shape: f32[8,32], index: 2, kind: output, shape index: {}]  }
   0x1   :  { %v20_v0 = vld [vmem:[%s217_s1 + $0x38] sm:$0xff]  ;;  %122 = vmatprep.subr.mxu0 %v168_v1  ;;  %v19_v2 = vld [vmem:[%s217_s1 + $0x30] sm:$0xff]  ;;  %138 = vmatprep.mubr.msk.f32.mxu0 %vm169_vm0, %v168_v1  ;;  %v18_v3 = vld [vmem:[%s217_s1 + $0x28] sm:$0xff] }
   0x2   :  { %123 = vmatpush3.msra.mxu0 %v20_v0 }
   0x3   :  { %124 = vmatprep.subr.mxu0 %v168_v1 }
   0x4   :  { %7 = vsyncpa [#allocation3], 0  ;;  %125 = vmatpush3.msra.mxu0 %v19_v2  ;;  %v17_v4 = vld [vmem:[%s217_s1 + $0x20] sm:$0xff]  ;;  %v16_v5 = vld [vmem:[%s217_s1 + $0x18] sm:$0xff]  ;;  %vm21_vm1 = vcmask 523264   ;;  %s170_s27 = smov [#allocation2]  }
   0x5   :  { %126 = vmatprep.subr.mxu0 %v168_v1  ;;  %v15_v6 = vld [vmem:[%s217_s1 + $0x10] sm:$0xff]  ;;  %v14_v7 = vld [vmem:[%s217_s1 + $0x8] sm:$0xff]  ;;  %v13_v8 = vld [vmem:[%s217_s1] sm:$0xff]  ;;  %s104_s28 = sshll.u32 %s170_s27, 4  ;;  %vm96_vm2 = vcmask 261120   ;;  %s105_s28 = int_to_ptr.vmem [resolvable:$true] %s104_s28 }
   0x6   :  { %127 = vmatpush3.msra.mxu0 %v18_v3  ;;  %v12_v9 = vld [vmem:[%s216_s0] sm:$0xff]  ;;  %s146_s29 = scalar_lea.vmem %s105_s28, 128  ;;  %p151_p1 = scmp.lt.s32.totalorder %s105_s28, %s105_s28 }
   0x7   :  { %128 = vmatprep.subr.mxu0 %v168_v1  ;;  %p147_p0 = scmp.ne.s32.totalorder %s105_s28, %s146_s29  ;;  %p152_p2 = scmp.lt.s32.totalorder %s146_s29, %s146_s29 }
   0x8   :  { %129 = vmatpush3.msra.mxu0 %v17_v4 }
   0x9   :  { %130 = vmatprep.subr.mxu0 %v168_v1  ;;  %p153_p3 = por %p152_p2, %p151_p1 }
   0xa   :  { %131 = vmatpush3.msra.mxu0 %v16_v5 }
   0xb   :  { %132 = vmatprep.subr.mxu0 %v168_v1  ;;  %p154_p4 = pnand %p153_p3, %p147_p0 }
   0xc   :  { %133 = vmatpush3.msra.mxu0 %v15_v6 }
   0xd   :  { %134 = vmatprep.subr.mxu0 %v168_v1 }
   0xe   :  { %135 = vmatpush3.msra.mxu0 %v14_v7 }
   0xf   :  { %136 = vmatprep.subr.mxu0 %v168_v1 }
  0x10   :  { %137 = vmatpush3.msra.mxu0 %v13_v8 }
  0x11   :  { %139 = vmatmul.mubr.msk.f32.vlgmr.msra.gmra.mxu0 %vm21_vm1, %v12_v9 }
  0xd1   :  { %v91_v10 = vpop.f32.mrf.mxu0 }
  0xd2   :  { %144 = vtanh.f32 %v91_v10 }
  0xd3   :  { %v140_v11 = vpop.f32.mrf.mxu0 }
  0xdf   :  { %v145_v12 = vpop.eup %144 }
  0xe0   :  { %97 = vst.msk [vmem:[#allocation2] sm:$0xff] %vm96_vm2, %v145_v12 }
  0xe1   :  { %157 = shalt.err (!%p154_p4)
}
  0xe2   :  { %107 = dma.vmem_to_hbm [thread:$0]  %s105_s28, 128, %s218_s2, [#allocation3]  }
  0xe3   :  { %166 = dma.done.wait [#allocation3], 128  }
  0xe4   :  { %167 = vsyncadd [#allocation3], 4294967168 }
  0xe5   :  { %111 = vsyncpa [#allocation3], 1 }

</bundles_post_ra>
